<compile_context>
chip_gen: v7x
topology: tpu7x:2x2x1
jax: 0.10.0
libtpu: 0.0.40
codegen_flags: <defaults>
</compile_context>

<pallas_src>
import functools

import jax
import jax.numpy as jnp
from jax import lax
from jax.experimental import pallas as pl
from jax.experimental.pallas import tpu as pltpu

IN_FEATURES = 500
NUM_CLASSES = 10

_K_PAD = 512      # 500 -> 512  (4 x 128 lanes)
_N_PAD = 128      # 10  -> 128  (1 x 128 lanes, unmasked stores)
_TB_MAX = 1024    # batch-tile rows: 1024*512*4B = 2 MiB per input buffer


def _round_up(x, m):
    return (x + m - 1) // m * m


# --------------------------------- kernels --------------------------------- #
def _eval_kernel(x_ref, w_ref, b_ref, o_ref):
    """relu -> (dropout == identity in eval) -> linear."""
    x = jnp.maximum(x_ref[...], 0.0)                                   # VPU
    acc = jnp.dot(x, w_ref[...], preferred_element_type=jnp.float32)   # MXU
    o_ref[...] = (acc + b_ref[...]).astype(o_ref.dtype)


def _train_kernel(seed_ref, x_ref, w_ref, b_ref, o_ref, *, block_rows):
    """relu -> dropout(p=0.5) -> linear (2x scale folded into the epilogue)."""
    x = jnp.maximum(x_ref[...], 0.0)

    # Counter-based uint32 hash -> Bernoulli(0.5) keep mask. Using global row
    # ids makes the mask independent across batch tiles for free.
    row0 = (pl.program_id(0) * block_rows).astype(jnp.uint32)
    r = lax.broadcasted_iota(jnp.uint32, x.shape, 0) + row0
    c = lax.broadcasted_iota(jnp.uint32, x.shape, 1)
    h = r * jnp.uint32(0x9E3779B1) + c * jnp.uint32(0x85EBCA77)
    h = h + seed_ref[0].astype(jnp.uint32)
    h = h ^ (h >> 16)
    h = h * jnp.uint32(0x7FEB352D)
    h = h ^ (h >> 15)
    h = h * jnp.uint32(0x846CA68B)
    h = h ^ (h >> 16)
    keep = (h >> 31) == jnp.uint32(0)                 # P(keep) = 0.5
    x = jnp.where(keep, x, 0.0)                       # select, no float mask

    acc = jnp.dot(x, w_ref[...], preferred_element_type=jnp.float32)
    # inverted-dropout scale 1/(1-p) = 2 on the small (TB, 128) accumulator
    o_ref[...] = (acc * jnp.float32(2.0) + b_ref[...]).astype(o_ref.dtype)


# --------------------------------- wrapper --------------------------------- #
@functools.partial(jax.jit, static_argnames=("training",))
def lenet_classifier(feat, w, b, *, training=False, seed=0):
    """Pallas forward of LeNetClassifier.

    feat: (B, 500) float32
    w:    (500, 10) float32  (transpose of PyTorch's (10, 500) fc2.weight)
    b:    (10,)     float32
    """
    B, D = feat.shape
    Dw, N = w.shape

    # Batch tiling: TB rows per grid step, B padded up to a multiple of TB.
    b8 = _round_up(max(B, 1), 8)
    tb = min(_TB_MAX, b8)
    b_pad = _round_up(B, tb)

    feat_p = jnp.pad(feat, ((0, b_pad - B), (0, _K_PAD - D)))
    w_p = jnp.pad(w, ((0, _K_PAD - Dw), (0, _N_PAD - N)))
    bias_p = jnp.pad(b.reshape(1, N), ((0, 0), (0, _N_PAD - N)))

    grid = (b_pad // tb,)
    out_shape = jax.ShapeDtypeStruct((b_pad, _N_PAD), feat.dtype)
    cparams = pltpu.CompilerParams(dimension_semantics=("parallel",))

    if not training:
        out = pl.pallas_call(
            _eval_kernel,
            out_shape=out_shape,
            grid_spec=pltpu.PrefetchScalarGridSpec(
                num_scalar_prefetch=0,
                grid=grid,
                in_specs=[
                    pl.BlockSpec((tb, _K_PAD), lambda i: (i, 0)),
                    pl.BlockSpec((_K_PAD, _N_PAD), lambda i: (0, 0)),
                    pl.BlockSpec((1, _N_PAD), lambda i: (0, 0)),
                ],
                out_specs=pl.BlockSpec((tb, _N_PAD), lambda i: (i, 0)),
            ),
            compiler_params=cparams,
        )(feat_p, w_p, bias_p)
    else:
        seed_arr = jnp.asarray([seed], dtype=jnp.int32)
        out = pl.pallas_call(
            functools.partial(_train_kernel, block_rows=tb),
            out_shape=out_shape,
            grid_spec=pltpu.PrefetchScalarGridSpec(
                num_scalar_prefetch=1,            # seed lands in SMEM
                grid=grid,
                in_specs=[
                    pl.BlockSpec((tb, _K_PAD), lambda i, s: (i, 0)),
                    pl.BlockSpec((_K_PAD, _N_PAD), lambda i, s: (0, 0)),
                    pl.BlockSpec((1, _N_PAD), lambda i, s: (0, 0)),
                ],
                out_specs=pl.BlockSpec((tb, _N_PAD), lambda i, s: (i, 0)),
            ),
            compiler_params=cparams,
        )(seed_arr, feat_p, w_p, bias_p)

    return out[:B, :N]


# --------------------------- params & reference ----------------------------- #
def init_params(key):
    """Deterministic fc2 params matching nn.Linear(500, 10) shapes."""
    kw, kb = jax.random.split(key)
    bound = 1.0 / (IN_FEATURES ** 0.5)   # PyTorch default init range
    w = jax.random.uniform(kw, (IN_FEATURES, NUM_CLASSES), jnp.float32, -bound, bound)
    b = jax.random.uniform(kb, (NUM_CLASSES,), jnp.float32, -bound, bound)
    return w, b


def reference_eval(feat, w, b):
    """Pure-JAX reference (eval mode: dropout is identity)."""
    return jnp.dot(jnp.maximum(feat, 0.0), w, precision=lax.Precision.HIGHEST) + b


if __name__ == "__main__":
    key = jax.random.PRNGKey(0)
    k_feat, k_feat2, k_params = jax.random.split(key, 3)

    w, b = init_params(k_params)

    # Eval mode: check against pure-JAX reference.
    batch = 8
    feat = jax.random.normal(k_feat, (batch, IN_FEATURES), dtype=jnp.float32)
    out = jax.block_until_ready(lenet_classifier(feat, w, b, training=False))
    ref = reference_eval(feat, w, b)
    assert out.shape == (batch, NUM_CLASSES)
    assert jnp.allclose(out, ref, atol=2e-3, rtol=2e-3)

    # Non-multiple-of-8 batch exercises the row-padding path.
    batch2 = 20
    feat2 = jax.random.normal(k_feat2, (batch2, IN_FEATURES), dtype=jnp.float32)
    out2 = jax.block_until_ready(lenet_classifier(feat2, w, b, training=False))
    ref2 = reference_eval(feat2, w, b)
    assert out2.shape == (batch2, NUM_CLASSES)
    assert jnp.allclose(out2, ref2, atol=2e-3, rtol=2e-3)

    # Training mode: stochastic dropout via the in-kernel hash PRNG.
    out_t1 = jax.block_until_ready(lenet_classifier(feat, w, b, training=True, seed=1234))
    out_t2 = jax.block_until_ready(lenet_classifier(feat, w, b, training=True, seed=4321))
    assert out_t1.shape == (batch, NUM_CLASSES)
    assert bool(jnp.all(jnp.isfinite(out_t1)))
    assert not bool(jnp.allclose(out_t1, out_t2))  # different seeds -> different masks

    print("KERNEL_OK")
</pallas_src>

<mosaic_0001>
module attributes {stable_mosaic.version = 11 : i64} {
  func.func @_eval_kernel(%arg0: i32, %arg1: memref<8x512xf32, #tpu.memory_space<vmem>>, %arg2: memref<512x128xf32, #tpu.memory_space<vmem>>, %arg3: memref<1x128xf32, #tpu.memory_space<vmem>>, %arg4: memref<8x128xf32, #tpu.memory_space<vmem>>) attributes {dimension_semantics = [#tpu.dimension_semantics<parallel>], iteration_bounds = array<i64: 1>, scalar_prefetch = 0 : i64, scratch_operands = 0 : i64, tpu.core_type = #tpu.core_type<tc>, window_params = [{transform_indices = @transform_0, window_bounds = array<i64: 8, 512>}, {pipeline_mode = #tpu.pipeline_mode<synchronous>, transform_indices = @transform_1, window_bounds = array<i64: 512, 128>}, {pipeline_mode = #tpu.pipeline_mode<synchronous>, transform_indices = @transform_2, window_bounds = array<i64: 1, 128>}, {transform_indices = @transform_3, window_bounds = array<i64: 8, 128>}]} {
    %c0 = arith.constant 0 : index
    %c0_0 = arith.constant 0 : index
    %0 = vector.load %arg1[%c0, %c0_0] : memref<8x512xf32, #tpu.memory_space<vmem>>, vector<8x512xf32>
    %cst = arith.constant 0.000000e+00 : f32
    %1 = vector.broadcast %cst : f32 to vector<8x512xf32>
    %2 = arith.maximumf %0, %1 : vector<8x512xf32>
    %c0_1 = arith.constant 0 : index
    %c0_2 = arith.constant 0 : index
    %3 = vector.load %arg2[%c0_1, %c0_2] : memref<512x128xf32, #tpu.memory_space<vmem>>, vector<512x128xf32>
    %cst_3 = arith.constant dense<0.000000e+00> : vector<8x128xf32>
    %4 = tpu.matmul %2, %3, %cst_3 {dimension_numbers = #tpu.dot_dimension_numbers<[1], [0], [0], [1], [0, 0, 1, 1], [], []>} : vector<8x512xf32>, vector<512x128xf32>, vector<8x128xf32> -> vector<8x128xf32>
    %c0_4 = arith.constant 0 : index
    %c0_5 = arith.constant 0 : index
    %5 = vector.load %arg3[%c0_4, %c0_5] : memref<1x128xf32, #tpu.memory_space<vmem>>, vector<1x128xf32>
    %6 = vector.broadcast %5 : vector<1x128xf32> to vector<8x128xf32>
    %7 = arith.addf %4, %6 : vector<8x128xf32>
    %c0_6 = arith.constant 0 : index
    %c0_7 = arith.constant 0 : index
    %8 = vector.load %arg4[%c0_6, %c0_7] : memref<8x128xf32, #tpu.memory_space<vmem>>, vector<8x128xf32>
    tpu.vector_store %arg4[%c0_6, %c0_7], %7 {strides = array<i32>} : memref<8x128xf32, #tpu.memory_space<vmem>>, vector<8x128xf32>,
    return
  }
  func.func @transform_0(%arg0: i32) -> (i32, i32) {
    %c0_i32 = arith.constant 0 : i32
    %c0_i32_0 = arith.constant 0 : i32
    return %arg0, %c0_i32 : i32, i32
  }
  func.func @transform_1(%arg0: i32) -> (i32, i32) {
    %c0_i32 = arith.constant 0 : i32
    %c0_i32_0 = arith.constant 0 : i32
    %c0_i32_1 = arith.constant 0 : i32
    return %c0_i32, %c0_i32_0 : i32, i32
  }
  func.func @transform_2(%arg0: i32) -> (i32, i32) {
    %c0_i32 = arith.constant 0 : i32
    %c0_i32_0 = arith.constant 0 : i32
    %c0_i32_1 = arith.constant 0 : i32
    return %c0_i32, %c0_i32_0 : i32, i32
  }
  func.func @transform_3(%arg0: i32) -> (i32, i32) {
    %c0_i32 = arith.constant 0 : i32
    %c0_i32_0 = arith.constant 0 : i32
    return %arg0, %c0_i32 : i32, i32
  }
}

</mosaic_0001>

<bundles_post_ra>
// kernel: lenet_classifier.1
= control target key start
LH: loop header
LB: loop body
LE: loop exit
PB: predicated region body
PF: predicated region fallthrough
CT: control target
= control target key end

     0   :  { %s649_s0 = inlined_call_operand.vmem [shape: f32[8,512], index: 0, kind: input, shape index: {}]   ;;  %s650_s1 = inlined_call_operand.vmem [shape: f32[512,128], index: 1, kind: input, shape index: {}]   ;;  %s651_s2 = inlined_call_operand.vmem [shape: f32[1,128], index: 2, kind: input, shape index: {}]   ;;  %s652_s3 = inlined_call_operand.hbm [shape: f32[8,128], index: 3, kind: output, shape index: {}]  }
   0x1   :  { %v39_v0 = vld [vmem:[%s650_s1 + $0x80] sm:$0xff]  ;;  %v40_v1 = vld [vmem:[%s650_s1 + $0x88] sm:$0xff]  ;;  %v41_v11 = vld [vmem:[%s650_s1 + $0x90] sm:$0xff] }
   0x2   :  { %v23_v2 = vld [vmem:[%s650_s1] sm:$0xff]  ;;  %v320_v3 = vpack.c.bf16 %v40_v1, %v39_v0  ;;  %v24_v4 = vld [vmem:[%s650_s1 + $0x8] sm:$0xff]  ;;  %v42_v13 = vld [vmem:[%s650_s1 + $0x98] sm:$0xff] }
   0x3   :  { %v71_v5 = vld [vmem:[%s650_s1 + $0x180] sm:$0xff]  ;;  %v72_v6 = vld [vmem:[%s650_s1 + $0x188] sm:$0xff]  ;;  %v322_v7 = vpack.c.bf16 %v24_v4, %v23_v2  ;;  %v25_v14 = vld [vmem:[%s650_s1 + $0x10] sm:$0xff]  ;;  %v324_v16 = vpack.c.bf16 %v42_v13, %v41_v11 }
   0x4   :  { %v352_v8 = vpack.c.bf16 %v72_v6, %v71_v5  ;;  %v55_v9 = vld [vmem:[%s650_s1 + $0x100] sm:$0xff]  ;;  %v56_v10 = vld [vmem:[%s650_s1 + $0x108] sm:$0xff]  ;;  %321 = vmatprep.subr.bf16.mxu0 %v320_v3  ;;  %v26_v15 = vld [vmem:[%s650_s1 + $0x18] sm:$0xff] }
   0x5   :  { %v354_v12 = vpack.c.bf16 %v56_v10, %v55_v9  ;;  %323 = vmatpush3.bf16.msra.mxu0 %v322_v7  ;;  %v326_v17 = vpack.c.bf16 %v26_v15, %v25_v14  ;;  %v73_v18 = vld [vmem:[%s650_s1 + $0x190] sm:$0xff]  ;;  %v74_v19 = vld [vmem:[%s650_s1 + $0x198] sm:$0xff]  ;;  %v43_v23 = vld [vmem:[%s650_s1 + $0xa0] sm:$0xff] }
   0x6   :  { %353 = vmatprep.subr.bf16.mxu1 %v352_v8  ;;  %v57_v20 = vld [vmem:[%s650_s1 + $0x110] sm:$0xff]  ;;  %v356_v21 = vpack.c.bf16 %v74_v19, %v73_v18  ;;  %v58_v22 = vld [vmem:[%s650_s1 + $0x118] sm:$0xff]  ;;  %v44_v24 = vld [vmem:[%s650_s1 + $0xa8] sm:$0xff]  ;;  %325 = vmatprep.subr.bf16.mxu0 %v324_v16 }
   0x7   :  { %355 = vmatpush3.bf16.msra.mxu1 %v354_v12  ;;  %v358_v25 = vpack.c.bf16 %v58_v22, %v57_v20  ;;  %v328_v26 = vpack.c.bf16 %v44_v24, %v43_v23  ;;  %v27_v27 = vld [vmem:[%s650_s1 + $0x20] sm:$0xff]  ;;  %v28_v28 = vld [vmem:[%s650_s1 + $0x28] sm:$0xff]  ;;  %v45_v35 = vld [vmem:[%s650_s1 + $0xb0] sm:$0xff] }
   0x8   :  { %v75_v29 = vld [vmem:[%s650_s1 + $0x1a0] sm:$0xff]  ;;  %357 = vmatprep.subr.bf16.mxu1 %v356_v21  ;;  %v76_v30 = vld [vmem:[%s650_s1 + $0x1a8] sm:$0xff]  ;;  %v330_v33 = vpack.c.bf16 %v28_v28, %v27_v27  ;;  %v46_v36 = vld [vmem:[%s650_s1 + $0xb8] sm:$0xff] }
   0x9   :  { %v59_v31 = vld [vmem:[%s650_s1 + $0x120] sm:$0xff]  ;;  %v60_v32 = vld [vmem:[%s650_s1 + $0x128] sm:$0xff]  ;;  %327 = vmatpush3.bf16.msra.mxu0 %v326_v17  ;;  %v360_v34 = vpack.c.bf16 %v76_v30, %v75_v29  ;;  %v29_v37 = vld [vmem:[%s650_s1 + $0x30] sm:$0xff]  ;;  %v332_v39 = vpack.c.bf16 %v46_v36, %v45_v35 }
   0xa   :  { %329 = vmatprep.subr.bf16.mxu0 %v328_v26  ;;  %v362_v38 = vpack.c.bf16 %v60_v32, %v59_v31  ;;  %v30_v40 = vld [vmem:[%s650_s1 + $0x38] sm:$0xff]  ;;  %v77_v41 = vld [vmem:[%s650_s1 + $0x1b0] sm:$0xff]  ;;  %v47_v46 = vld [vmem:[%s650_s1 + $0xc0] sm:$0xff] }
   0xb   :  { %359 = vmatpush3.bf16.msra.mxu1 %v358_v25  ;;  %v78_v42 = vld [vmem:[%s650_s1 + $0x1b8] sm:$0xff]  ;;  %v61_v44 = vld [vmem:[%s650_s1 + $0x130] sm:$0xff]  ;;  %v48_v47 = vld [vmem:[%s650_s1 + $0xc8] sm:$0xff]  ;;  %v334_v48 = vpack.c.bf16 %v30_v40, %v29_v37 }
   0xc   :  { %361 = vmatprep.subr.bf16.mxu1 %v360_v34  ;;  %v364_v43 = vpack.c.bf16 %v78_v42, %v77_v41  ;;  %v62_v45 = vld [vmem:[%s650_s1 + $0x138] sm:$0xff]  ;;  %v79_v49 = vld [vmem:[%s650_s1 + $0x1c0] sm:$0xff]  ;;  %v80_v50 = vld [vmem:[%s650_s1 + $0x1c8] sm:$0xff]  ;;  %v336_v52 = vpack.c.bf16 %v48_v47, %v47_v46 }
   0xd   :  { %331 = vmatpush3.bf16.msra.mxu0 %v330_v33  ;;  %v366_v51 = vpack.c.bf16 %v62_v45, %v61_v44  ;;  %v31_v53 = vld [vmem:[%s650_s1 + $0x40] sm:$0xff]  ;;  %v32_v54 = vld [vmem:[%s650_s1 + $0x48] sm:$0xff]  ;;  %v368_v56 = vpack.c.bf16 %v80_v50, %v79_v49  ;;  %v49_v58 = vld [vmem:[%s650_s1 + $0xd0] sm:$0xff] }
   0xe   :  { %333 = vmatprep.subr.bf16.mxu0 %v332_v39  ;;  %v63_v55 = vld [vmem:[%s650_s1 + $0x140] sm:$0xff]  ;;  %v64_v57 = vld [vmem:[%s650_s1 + $0x148] sm:$0xff]  ;;  %v50_v59 = vld [vmem:[%s650_s1 + $0xd8] sm:$0xff]  ;;  %v338_v62 = vpack.c.bf16 %v32_v54, %v31_v53 }
   0xf   :  { %363 = vmatpush3.bf16.msra.mxu1 %v362_v38  ;;  %v81_v60 = vld [vmem:[%s650_s1 + $0x1d0] sm:$0xff]  ;;  %v82_v61 = vld [vmem:[%s650_s1 + $0x1d8] sm:$0xff]  ;;  %v370_v63 = vpack.c.bf16 %v64_v57, %v63_v55  ;;  %v340_v0 = vpack.c.bf16 %v50_v59, %v49_v58  ;;  %v51_v6 = vld [vmem:[%s650_s1 + $0xe0] sm:$0xff] }
  0x10   :  { %365 = vmatprep.subr.bf16.mxu1 %v364_v43  ;;  %v33_v1 = vld [vmem:[%s650_s1 + $0x50] sm:$0xff]  ;;  %v34_v2 = vld [vmem:[%s650_s1 + $0x58] sm:$0xff]  ;;  %v372_v4 = vpack.c.bf16 %v82_v61, %v81_v60  ;;  %v52_v7 = vld [vmem:[%s650_s1 + $0xe8] sm:$0xff] }
  0x11   :  { %335 = vmatpush3.bf16.msra.mxu0 %v334_v48  ;;  %v65_v3 = vld [vmem:[%s650_s1 + $0x150] sm:$0xff]  ;;  %v66_v5 = vld [vmem:[%s650_s1 + $0x158] sm:$0xff]  ;;  %v83_v8 = vld [vmem:[%s650_s1 + $0x1e0] sm:$0xff]  ;;  %v342_v10 = vpack.c.bf16 %v34_v2, %v33_v1  ;;  %v344_v15 = vpack.c.bf16 %v52_v7, %v51_v6 }
  0x12   :  { %337 = vmatprep.subr.bf16.mxu0 %v336_v52  ;;  %v84_v9 = vld [vmem:[%s650_s1 + $0x1e8] sm:$0xff]  ;;  %v35_v11 = vld [vmem:[%s650_s1 + $0x60] sm:$0xff]  ;;  %v374_v14 = vpack.c.bf16 %v66_v5, %v65_v3  ;;  %v53_v17 = vld [vmem:[%s650_s1 + $0xf0] sm:$0xff] }
  0x13   :  { %367 = vmatpush3.bf16.msra.mxu1 %v366_v51  ;;  %v36_v12 = vld [vmem:[%s650_s1 + $0x68] sm:$0xff]  ;;  %v67_v13 = vld [vmem:[%s650_s1 + $0x160] sm:$0xff]  ;;  %v376_v19 = vpack.c.bf16 %v84_v9, %v83_v8  ;;  %v54_v20 = vld [vmem:[%s650_s1 + $0xf8] sm:$0xff] }
  0x14   :  { %369 = vmatprep.subr.bf16.mxu1 %v368_v56  ;;  %v68_v16 = vld [vmem:[%s650_s1 + $0x168] sm:$0xff]  ;;  %v18_v22 = vld [vmem:[%s649_s0 + $0x18] sm:$0xff] }
  0x15   :  { %339 = vmatpush3.bf16.msra.mxu0 %v338_v62  ;;  %v16_v18 = vld [vmem:[%s649_s0 + $0x8] sm:$0xff] }
  0x16   :  { %341 = vmatprep.subr.bf16.mxu0 %v340_v0  ;;  %v20_v21 = vmax.f32 %v16_v18, 0.0 }
  0x17   :  { %371 = vmatpush3.bf16.msra.mxu1 %v370_v63 }
  0x18   :  { %373 = vmatprep.subr.bf16.mxu1 %v372_v4 }
  0x19   :  { %8 = vsyncpa [#allocation3], 0  ;;  %v85_v23 = vld [vmem:[%s650_s1 + $0x1f0] sm:$0xff]  ;;  %v86_v24 = vld [vmem:[%s650_s1 + $0x1f8] sm:$0xff]  ;;  %v22_v25 = vmax.f32 %v18_v22, 0.0  ;;  %343 = vmatpush3.bf16.msra.mxu0 %v342_v10  ;;  %v346_v26 = vpack.c.bf16 %v36_v12, %v35_v11  ;;  %158 = vmatprep.mubr.f32.mxu0 %v20_v21  ;;  %v378_v27 = vpack.c.bf16 %v68_v16, %v67_v13  ;;  %v348_v28 = vpack.c.bf16 %v54_v20, %v53_v17  ;;  %s409_s14 = smov [#allocation2]  }
  0x1a   :  { %345 = vmatprep.subr.bf16.mxu0 %v344_v15  ;;  %v37_v29 = vld [vmem:[%s650_s1 + $0x70] sm:$0xff]  ;;  %v38_v30 = vld [vmem:[%s650_s1 + $0x78] sm:$0xff]  ;;  %v380_v31 = vpack.c.bf16 %v86_v24, %v85_v23  ;;  %v15_v35 = vld [vmem:[%s649_s0] sm:$0xff]  ;;  %s241_s15 = sshll.u32 %s409_s14, 4  ;;  %s242_s15 = int_to_ptr.vmem [resolvable:$true] %s241_s15 }
  0x1b   :  { %375 = vmatpush3.bf16.msra.mxu1 %v374_v14  ;;  %v69_v32 = vld [vmem:[%s650_s1 + $0x170] sm:$0xff]  ;;  %v70_v33 = vld [vmem:[%s650_s1 + $0x178] sm:$0xff]  ;;  %228 = vmatprep.mubr.f32.mxu1 %v22_v25  ;;  %v350_v34 = vpack.c.bf16 %v38_v30, %v37_v29  ;;  %v19_v38 = vmax.f32 %v15_v35, 0.0  ;;  %v249_v41 = vld [vmem:[%s651_s2] ss:$0 sm:$0xff]  ;;  %p390_p1 = scmp.lt.s32.totalorder %s242_s15, %s242_s15 }
  0x1c   :  { %377 = vmatprep.subr.bf16.mxu1 %v376_v19  ;;  %v382_v36 = vpack.c.bf16 %v70_v33, %v69_v32  ;;  %v17_v37 = vld [vmem:[%s649_s0 + $0x10] sm:$0xff]  ;;  %s385_s0 = scalar_lea.vmem %s242_s15, 128 }
  0x1d   :  { %347 = vmatpush3.bf16.msra.mxu0 %v346_v26  ;;  %v21_v39 = vmax.f32 %v17_v37, 0.0  ;;  %p386_p0 = scmp.ne.s32.totalorder %s242_s15, %s385_s0  ;;  %p391_p2 = scmp.lt.s32.totalorder %s385_s0, %s385_s0 }
  0x1e   :  { %349 = vmatprep.subr.bf16.mxu0 %v348_v28 }
  0x1f   :  { %379 = vmatpush3.bf16.msra.mxu1 %v378_v27  ;;  %p392_p3 = por %p391_p2, %p390_p1 }
  0x20   :  { %381 = vmatprep.subr.bf16.mxu1 %v380_v31 }
  0x21   :  { %351 = vmatpush3.bf16.msra.mxu0 %v350_v34  ;;  %p393_p4 = pnand %p392_p3, %p386_p0 }
  0x23   :  { %383 = vmatpush3.bf16.msra.mxu1 %v382_v36 }
  0x24   :  { %159 = vmatmul.mubr.f32.vlgmr.msra.gmra.mrb[0].mxu0 %v19_v38 }
  0x26   :  { %229 = vmatmul.mubr.f32.vlgmr.msra.gmra.mrb[0].mxu1 %v21_v39 }
  0xf7   :  { %v282_v40 = vpop.f32.mrb[0].mxu0 }
  0xf8   :  { %v283_v42 = vpop.f32.mrb[1].mxu0 }
  0xf9   :  { %v317_v43 = vpop.f32.mrb[0].mxu1  ;;  %v284_v44 = vadd.f32 %v283_v42, %v282_v40 }
  0xfa   :  { %v318_v45 = vpop.f32.mrb[1].mxu1 }
  0xfb   :  { %v319_v46 = vadd.f32 %v318_v45, %v317_v43  ;;  %v161_v47 = vadd.f32 %v284_v44, %v249_v41 }
  0xfd   :  { %v231_v48 = vadd.f32 %v319_v46, %v161_v47 }
  0xff   :  { %234 = vst [vmem:[#allocation2] sm:$0xff] %v231_v48 }
 0x100   :  { %396 = shalt.err (!%p393_p4)
}
 0x101   :  { %s397_s17 = scalar_lea.hbm %s652_s3, 128 }
 0x102   :  { %p398_p5 = scmp.ne.s32.totalorder %s652_s3, %s397_s17  ;;  %p401_p6 = scmp.lt.u32.totalorder %s397_s17, %s652_s3 }
 0x104   :  { %p403_p7 = pnand %p401_p6, %p398_p5 }
 0x106   :  { %406 = shalt.err (!%p403_p7)
}
 0x107   :  { %244 = dma.vmem_to_hbm [thread:$0]  %s242_s15, 128, %s652_s3, [#allocation3]  }
 0x108   :  { %407 = dma.done.wait [#allocation3], 128  }
 0x109   :  { %408 = vsyncadd [#allocation3], 4294967168 }
 0x10a   :  { %248 = vsyncpa [#allocation3], 1 }

</bundles_post_ra>
